<compile_context>
chip_gen: v5e
topology: v5e:2x2
jax: 0.10.0
libtpu: 0.0.40
codegen_flags: <defaults>
</compile_context>

<pallas_src>
import jax
import jax.numpy as jnp
from jax import lax
from jax.experimental import pallas as pl
from jax.experimental.pallas import tpu as pltpu

EPS = 1e-5


def res_layers_kernel(
    x_ref,    # (C, M)     input activation (constant block index -> fetched once)
    w1_ref,   # (1, C, C)  layer-i conv1 weight, (C_out, C_in)
    g1_ref,   # (1, C, 1)  layer-i bn1 gamma
    be1_ref,  # (1, C, 1)  layer-i bn1 beta
    w2_ref,   # (1, C, C)
    g2_ref,   # (1, C, 1)
    be2_ref,  # (1, C, 1)
    o_ref,    # (C, M)     output block; constant index_map => VMEM-resident across
              #            the serial layer grid, used as the running activation
):
    i = pl.program_id(0)
    inv_m = jnp.float32(1.0 / o_ref.shape[1])

    @pl.when(i == 0)
    def _():
        o_ref[...] = x_ref[...]

    x = o_ref[...]

    def conv_bn(h_in, w_ref, g_ref, be_ref):
        # 1x1 conv: (C, C) @ (C, M) on the MXU. Conv bias omitted: it is a
        # mathematical no-op under the training-mode BN that immediately follows.
        h = jnp.dot(w_ref[0], h_in, preferred_element_type=jnp.float32)
        # Fused BN: single pass of per-channel sum / sum-of-squares over the lane
        # axis (XLU reduce), then one per-channel FMA on the slab.
        s = jnp.sum(h, axis=1, keepdims=True)        # (C, 1)
        ss = jnp.sum(h * h, axis=1, keepdims=True)   # (C, 1)
        mu = s * inv_m
        var = ss * inv_m - mu * mu
        scale = g_ref[0] * lax.rsqrt(var + EPS)      # (C, 1), EUP rsqrt
        shift = be_ref[0] - mu * scale
        return h * scale + shift

    h = jnp.maximum(conv_bn(x, w1_ref, g1_ref, be1_ref), 0.0)
    # residual add + relu; single full-slab store per layer
    o_ref[...] = jnp.maximum(conv_bn(h, w2_ref, g2_ref, be2_ref) + x, 0.0)


def res_layers_pallas(x_nchw, params):
    """x_nchw: (N, C, H, W) float32.  params: dict of stacked per-layer tensors."""
    N, C, H, W = x_nchw.shape
    M = N * H * W
    size = params["w1"].shape[0]

    # Glue: NCHW -> (C, M). M maps to lanes (dense vregs / unmasked stores when
    # M % 128 == 0), C maps to sublanes.
    x2d = jnp.transpose(x_nchw, (1, 0, 2, 3)).reshape(C, M)

    slab_spec = pl.BlockSpec((C, M), lambda i: (0, 0))
    w_spec = pl.BlockSpec((1, C, C), lambda i: (i, 0, 0))
    v_spec = pl.BlockSpec((1, C, 1), lambda i: (i, 0, 0))

    # Explicit scoped-VMEM budget from the footprint (+ headroom for temporaries),
    # capped at v7x's 64 MiB physical VMEM.
    slab_b = C * M * 4
    w_b = C * C * 4
    v_b = C * 4
    footprint = 4 * slab_b + 2 * 2 * w_b + 4 * 2 * v_b + (4 << 20)
    vmem_limit = int(min(max(footprint, 32 << 20), 64 << 20))

    out2d = pl.pallas_call(
        res_layers_kernel,
        out_shape=jax.ShapeDtypeStruct((C, M), jnp.float32),
        grid_spec=pltpu.PrefetchScalarGridSpec(
            num_scalar_prefetch=0,
            grid=(size,),
            in_specs=[
                slab_spec,                 # x
                w_spec, v_spec, v_spec,    # w1, g1, be1
                w_spec, v_spec, v_spec,    # w2, g2, be2
            ],
            out_specs=slab_spec,
        ),
        compiler_params=pltpu.CompilerParams(
            dimension_semantics=("arbitrary",),   # serial dependency across layers
            vmem_limit_bytes=vmem_limit,
        ),
    )(
        x2d,
        params["w1"], params["g1"], params["be1"],
        params["w2"], params["g2"], params["be2"],
    )

    # Glue: (C, M) -> NCHW
    return jnp.transpose(out2d.reshape(C, N, H, W), (1, 0, 2, 3))


def make_params(key, channels, size):
    """Deterministic synthetic parameters matching the PyTorch module's shapes.

    Conv2d(channels, channels, 1): weight (C_out, C_in, 1, 1) -> stored (S, C_out, C_in);
    bias (C,) -> stored (S, C) but used ONLY by the reference (it is exactly cancelled
    by the training-mode BN that follows, so the kernel never loads it).
    BatchNorm2d(channels): weight/bias (C,) -> stored (S, C, 1) for lane-broadcast.
    """
    keys = jax.random.split(key, 8)
    C, S = channels, size
    return {
        "w1": jax.random.normal(keys[0], (S, C, C), jnp.float32) * 0.3,   # (out, in)
        "w2": jax.random.normal(keys[1], (S, C, C), jnp.float32) * 0.3,
        "b1": jax.random.normal(keys[2], (S, C), jnp.float32) * 0.1,      # reference only
        "b2": jax.random.normal(keys[3], (S, C), jnp.float32) * 0.1,      # reference only
        "g1": 1.0 + 0.1 * jax.random.normal(keys[4], (S, C, 1), jnp.float32),
        "g2": 1.0 + 0.1 * jax.random.normal(keys[5], (S, C, 1), jnp.float32),
        "be1": 0.1 * jax.random.normal(keys[6], (S, C, 1), jnp.float32),
        "be2": 0.1 * jax.random.normal(keys[7], (S, C, 1), jnp.float32),
    }


def res_layers_reference(x_nchw, params):
    """Pure-JAX reference with full PyTorch semantics (including conv biases and
    two-pass BN statistics) for the correctness check."""
    N, C, H, W = x_nchw.shape
    x = jnp.transpose(x_nchw, (0, 2, 3, 1)).reshape(N * H * W, C)
    size = params["w1"].shape[0]

    def bn(h, gamma, beta):
        mu = h.mean(0, keepdims=True)
        var = ((h - mu) ** 2).mean(0, keepdims=True)
        return (h - mu) / jnp.sqrt(var + EPS) * gamma + beta

    for i in range(size):
        g1 = params["g1"][i][:, 0][None, :]
        be1 = params["be1"][i][:, 0][None, :]
        g2 = params["g2"][i][:, 0][None, :]
        be2 = params["be2"][i][:, 0][None, :]
        h = x @ params["w1"][i].T + params["b1"][i][None, :]
        h = jnp.maximum(bn(h, g1, be1), 0.0)
        h = h @ params["w2"][i].T + params["b2"][i][None, :]
        h = bn(h, g2, be2)
        x = jnp.maximum(h + x, 0.0)
    return jnp.transpose(x.reshape(N, H, W, C), (0, 3, 1, 2))


if __name__ == "__main__":
    N, C, H, W = 2, 4, 16, 16
    SIZE = 3  # number of residual blocks

    key = jax.random.PRNGKey(0)
    kx, kp = jax.random.split(key)
    x = jax.random.normal(kx, (N, C, H, W), jnp.float32)
    params = make_params(kp, C, SIZE)

    out = jax.jit(res_layers_pallas)(x, params)
    out = jax.block_until_ready(out)

    ref = res_layers_reference(x, params)
    assert out.shape == (N, C, H, W), out.shape
    max_err = float(jnp.abs(out - ref).max())
    assert jnp.allclose(out, ref, rtol=1e-4, atol=1e-4), max_err

    print("KERNEL_OK")
</pallas_src>

<mosaic_0001>
module attributes {stable_mosaic.version = 11 : i64} {
  func.func @res_layers_kernel(%arg0: i32, %arg1: memref<4x512xf32, #tpu.memory_space<vmem>>, %arg2: memref<1x4x4xf32, #tpu.memory_space<vmem>>, %arg3: memref<1x4x1xf32, #tpu.memory_space<vmem>>, %arg4: memref<1x4x1xf32, #tpu.memory_space<vmem>>, %arg5: memref<1x4x4xf32, #tpu.memory_space<vmem>>, %arg6: memref<1x4x1xf32, #tpu.memory_space<vmem>>, %arg7: memref<1x4x1xf32, #tpu.memory_space<vmem>>, %arg8: memref<4x512xf32, #tpu.memory_space<vmem>>) attributes {dimension_semantics = [#tpu.dimension_semantics<arbitrary>], iteration_bounds = array<i64: 3>, scalar_prefetch = 0 : i64, scratch_operands = 0 : i64, tpu.core_type = #tpu.core_type<tc>, window_params = [{pipeline_mode = #tpu.pipeline_mode<synchronous>, transform_indices = @transform_0, window_bounds = array<i64: 4, 512>}, {transform_indices = @transform_1, window_bounds = array<i64: 1, 4, 4>}, {transform_indices = @transform_2, window_bounds = array<i64: 1, 4, 1>}, {transform_indices = @transform_3, window_bounds = array<i64: 1, 4, 1>}, {transform_indices = @transform_4, window_bounds = array<i64: 1, 4, 4>}, {transform_indices = @transform_5, window_bounds = array<i64: 1, 4, 1>}, {transform_indices = @transform_6, window_bounds = array<i64: 1, 4, 1>}, {pipeline_mode = #tpu.pipeline_mode<synchronous>, transform_indices = @transform_7, window_bounds = array<i64: 4, 512>}]} {
    %c0_i32 = arith.constant 0 : i32
    %0 = arith.cmpi eq, %arg0, %c0_i32 : i32
    %1 = arith.extui %0 : i1 to i32
    %c0_i32_0 = arith.constant 0 : i32
    %2 = arith.cmpi ne, %1, %c0_i32_0 : i32
    scf.if %2 {
      %c0_35 = arith.constant 0 : index
      %c0_36 = arith.constant 0 : index
      %66 = vector.load %arg1[%c0_35, %c0_36] : memref<4x512xf32, #tpu.memory_space<vmem>>, vector<4x512xf32>
      %c0_37 = arith.constant 0 : index
      %c0_38 = arith.constant 0 : index
      %67 = vector.load %arg8[%c0_37, %c0_38] : memref<4x512xf32, #tpu.memory_space<vmem>>, vector<4x512xf32>
      tpu.vector_store %arg8[%c0_37, %c0_38], %66 {strides = array<i32>} : memref<4x512xf32, #tpu.memory_space<vmem>>, vector<4x512xf32>,
    } else {
    }
    %c0 = arith.constant 0 : index
    %c0_1 = arith.constant 0 : index
    %3 = vector.load %arg8[%c0, %c0_1] : memref<4x512xf32, #tpu.memory_space<vmem>>, vector<4x512xf32>
    %c0_2 = arith.constant 0 : index
    %c0_3 = arith.constant 0 : index
    %c0_4 = arith.constant 0 : index
    %4 = vector.load %arg2[%c0_2, %c0_3, %c0_4] : memref<1x4x4xf32, #tpu.memory_space<vmem>>, vector<1x4x4xf32>
    %5 = vector.shape_cast %4 : vector<1x4x4xf32> to vector<4x4xf32>
    %cst = arith.constant dense<0.000000e+00> : vector<4x512xf32>
    %6 = tpu.matmul %5, %3, %cst {dimension_numbers = #tpu.dot_dimension_numbers<[1], [0], [0], [1], [0, 0, 1, 1], [], []>} : vector<4x4xf32>, vector<4x512xf32>, vector<4x512xf32> -> vector<4x512xf32>
    %cst_5 = arith.constant dense<0.000000e+00> : vector<4xf32>
    %7 = vector.multi_reduction <add>, %6, %cst_5 [1] : vector<4x512xf32> to vector<4xf32>
    %8 = vector.shape_cast %7 : vector<4xf32> to vector<4x1xf32>
    %9 = arith.mulf %6, %6 : vector<4x512xf32>
    %cst_6 = arith.constant dense<0.000000e+00> : vector<4xf32>
    %10 = vector.multi_reduction <add>, %9, %cst_6 [1] : vector<4x512xf32> to vector<4xf32>
    %11 = vector.shape_cast %10 : vector<4xf32> to vector<4x1xf32>
    %cst_7 = arith.constant 0.001953125 : f32
    %12 = vector.broadcast %cst_7 : f32 to vector<4x1xf32>
    %13 = arith.mulf %8, %12 : vector<4x1xf32>
    %cst_8 = arith.constant 0.001953125 : f32
    %14 = vector.broadcast %cst_8 : f32 to vector<4x1xf32>
    %15 = arith.mulf %11, %14 : vector<4x1xf32>
    %16 = arith.mulf %13, %13 : vector<4x1xf32>
    %17 = arith.subf %15, %16 : vector<4x1xf32>
    %c0_9 = arith.constant 0 : index
    %c0_10 = arith.constant 0 : index
    %c0_11 = arith.constant 0 : index
    %18 = vector.load %arg3[%c0_9, %c0_10, %c0_11] : memref<1x4x1xf32, #tpu.memory_space<vmem>>, vector<1x4x1xf32>
    %19 = vector.shape_cast %18 : vector<1x4x1xf32> to vector<4x1xf32>
    %cst_12 = arith.constant 9.99999974E-6 : f32
    %20 = vector.broadcast %cst_12 : f32 to vector<4x1xf32>
    %21 = arith.addf %17, %20 : vector<4x1xf32>
    %22 = math.rsqrt %21 : vector<4x1xf32>
    %23 = arith.mulf %19, %22 : vector<4x1xf32>
    %c0_13 = arith.constant 0 : index
    %c0_14 = arith.constant 0 : index
    %c0_15 = arith.constant 0 : index
    %24 = vector.load %arg4[%c0_13, %c0_14, %c0_15] : memref<1x4x1xf32, #tpu.memory_space<vmem>>, vector<1x4x1xf32>
    %25 = vector.shape_cast %24 : vector<1x4x1xf32> to vector<4x1xf32>
    %26 = arith.mulf %13, %23 : vector<4x1xf32>
    %27 = arith.subf %25, %26 : vector<4x1xf32>
    %28 = vector.broadcast %23 : vector<4x1xf32> to vector<4x512xf32>
    %29 = arith.mulf %6, %28 : vector<4x512xf32>
    %30 = vector.broadcast %27 : vector<4x1xf32> to vector<4x512xf32>
    %31 = arith.addf %29, %30 : vector<4x512xf32>
    %cst_16 = arith.constant 0.000000e+00 : f32
    %32 = vector.broadcast %cst_16 : f32 to vector<4x512xf32>
    %33 = arith.maximumf %31, %32 : vector<4x512xf32>
    %c0_17 = arith.constant 0 : index
    %c0_18 = arith.constant 0 : index
    %c0_19 = arith.constant 0 : index
    %34 = vector.load %arg5[%c0_17, %c0_18, %c0_19] : memref<1x4x4xf32, #tpu.memory_space<vmem>>, vector<1x4x4xf32>
    %35 = vector.shape_cast %34 : vector<1x4x4xf32> to vector<4x4xf32>
    %cst_20 = arith.constant dense<0.000000e+00> : vector<4x512xf32>
    %36 = tpu.matmul %35, %33, %cst_20 {dimension_numbers = #tpu.dot_dimension_numbers<[1], [0], [0], [1], [0, 0, 1, 1], [], []>} : vector<4x4xf32>, vector<4x512xf32>, vector<4x512xf32> -> vector<4x512xf32>
    %cst_21 = arith.constant dense<0.000000e+00> : vector<4xf32>
    %37 = vector.multi_reduction <add>, %36, %cst_21 [1] : vector<4x512xf32> to vector<4xf32>
    %38 = vector.shape_cast %37 : vector<4xf32> to vector<4x1xf32>
    %39 = arith.mulf %36, %36 : vector<4x512xf32>
    %cst_22 = arith.constant dense<0.000000e+00> : vector<4xf32>
    %40 = vector.multi_reduction <add>, %39, %cst_22 [1] : vector<4x512xf32> to vector<4xf32>
    %41 = vector.shape_cast %40 : vector<4xf32> to vector<4x1xf32>
    %cst_23 = arith.constant 0.001953125 : f32
    %42 = vector.broadcast %cst_23 : f32 to vector<4x1xf32>
    %43 = arith.mulf %38, %42 : vector<4x1xf32>
    %cst_24 = arith.constant 0.001953125 : f32
    %44 = vector.broadcast %cst_24 : f32 to vector<4x1xf32>
    %45 = arith.mulf %41, %44 : vector<4x1xf32>
    %46 = arith.mulf %43, %43 : vector<4x1xf32>
    %47 = arith.subf %45, %46 : vector<4x1xf32>
    %c0_25 = arith.constant 0 : index
    %c0_26 = arith.constant 0 : index
    %c0_27 = arith.constant 0 : index
    %48 = vector.load %arg6[%c0_25, %c0_26, %c0_27] : memref<1x4x1xf32, #tpu.memory_space<vmem>>, vector<1x4x1xf32>
    %49 = vector.shape_cast %48 : vector<1x4x1xf32> to vector<4x1xf32>
    %cst_28 = arith.constant 9.99999974E-6 : f32
    %50 = vector.broadcast %cst_28 : f32 to vector<4x1xf32>
    %51 = arith.addf %47, %50 : vector<4x1xf32>
    %52 = math.rsqrt %51 : vector<4x1xf32>
    %53 = arith.mulf %49, %52 : vector<4x1xf32>
    %c0_29 = arith.constant 0 : index
    %c0_30 = arith.constant 0 : index
    %c0_31 = arith.constant 0 : index
    %54 = vector.load %arg7[%c0_29, %c0_30, %c0_31] : memref<1x4x1xf32, #tpu.memory_space<vmem>>, vector<1x4x1xf32>
    %55 = vector.shape_cast %54 : vector<1x4x1xf32> to vector<4x1xf32>
    %56 = arith.mulf %43, %53 : vector<4x1xf32>
    %57 = arith.subf %55, %56 : vector<4x1xf32>
    %58 = vector.broadcast %53 : vector<4x1xf32> to vector<4x512xf32>
    %59 = arith.mulf %36, %58 : vector<4x512xf32>
    %60 = vector.broadcast %57 : vector<4x1xf32> to vector<4x512xf32>
    %61 = arith.addf %59, %60 : vector<4x512xf32>
    %62 = arith.addf %61, %3 : vector<4x512xf32>
    %cst_32 = arith.constant 0.000000e+00 : f32
    %63 = vector.broadcast %cst_32 : f32 to vector<4x512xf32>
    %64 = arith.maximumf %62, %63 : vector<4x512xf32>
    %c0_33 = arith.constant 0 : index
    %c0_34 = arith.constant 0 : index
    %65 = vector.load %arg8[%c0_33, %c0_34] : memref<4x512xf32, #tpu.memory_space<vmem>>, vector<4x512xf32>
    tpu.vector_store %arg8[%c0_33, %c0_34], %64 {strides = array<i32>} : memref<4x512xf32, #tpu.memory_space<vmem>>, vector<4x512xf32>,
    return
  }
  func.func @transform_0(%arg0: i32) -> (i32, i32) {
    %c0_i32 = arith.constant 0 : i32
    %c0_i32_0 = arith.constant 0 : i32
    %c0_i32_1 = arith.constant 0 : i32
    return %c0_i32, %c0_i32_0 : i32, i32
  }
  func.func @transform_1(%arg0: i32) -> (i32, i32, i32) {
    %c0_i32 = arith.constant 0 : i32
    %c0_i32_0 = arith.constant 0 : i32
    %c0_i32_1 = arith.constant 0 : i32
    return %arg0, %c0_i32, %c0_i32_0 : i32, i32, i32
  }
  func.func @transform_2(%arg0: i32) -> (i32, i32, i32) {
    %c0_i32 = arith.constant 0 : i32
    %c0_i32_0 = arith.constant 0 : i32
    %c0_i32_1 = arith.constant 0 : i32
    return %arg0, %c0_i32, %c0_i32_0 : i32, i32, i32
  }
  func.func @transform_3(%arg0: i32) -> (i32, i32, i32) {
    %c0_i32 = arith.constant 0 : i32
    %c0_i32_0 = arith.constant 0 : i32
    %c0_i32_1 = arith.constant 0 : i32
    return %arg0, %c0_i32, %c0_i32_0 : i32, i32, i32
  }
  func.func @transform_4(%arg0: i32) -> (i32, i32, i32) {
    %c0_i32 = arith.constant 0 : i32
    %c0_i32_0 = arith.constant 0 : i32
    %c0_i32_1 = arith.constant 0 : i32
    return %arg0, %c0_i32, %c0_i32_0 : i32, i32, i32
  }
  func.func @transform_5(%arg0: i32) -> (i32, i32, i32) {
    %c0_i32 = arith.constant 0 : i32
    %c0_i32_0 = arith.constant 0 : i32
    %c0_i32_1 = arith.constant 0 : i32
    return %arg0, %c0_i32, %c0_i32_0 : i32, i32, i32
  }
  func.func @transform_6(%arg0: i32) -> (i32, i32, i32) {
    %c0_i32 = arith.constant 0 : i32
    %c0_i32_0 = arith.constant 0 : i32
    %c0_i32_1 = arith.constant 0 : i32
    return %arg0, %c0_i32, %c0_i32_0 : i32, i32, i32
  }
  func.func @transform_7(%arg0: i32) -> (i32, i32) {
    %c0_i32 = arith.constant 0 : i32
    %c0_i32_0 = arith.constant 0 : i32
    %c0_i32_1 = arith.constant 0 : i32
    return %c0_i32, %c0_i32_0 : i32, i32
  }
}

</mosaic_0001>

<bundles_post_ra>
// kernel: res_layers_pallas.1
= control target key start
LH: loop header
LB: loop body
LE: loop exit
PB: predicated region body
PF: predicated region fallthrough
CT: control target
= control target key end

     0   :  { %s891_s24 = smov 0   ;;  %s1011_s0 = inlined_call_operand.vmem [shape: f32[4,512], index: 0, kind: input, shape index: {}]   ;;  %s1012_s1 = inlined_call_operand.vmem [shape: f32[3,4,4], index: 1, kind: input, shape index: {}]   ;;  %s1013_s2 = inlined_call_operand.vmem [shape: f32[3,4,1], index: 2, kind: input, shape index: {}]   ;;  %s1014_s3 = inlined_call_operand.vmem [shape: f32[3,4,1], index: 3, kind: input, shape index: {}]   ;;  %s1015_s4 = inlined_call_operand.vmem [shape: f32[3,4,4], index: 4, kind: input, shape index: {}]   ;;  %s1016_s5 = inlined_call_operand.vmem [shape: f32[3,4,1], index: 5, kind: input, shape index: {}]   ;;  %s1017_s6 = inlined_call_operand.vmem [shape: f32[3,4,1], index: 6, kind: input, shape index: {}]   ;;  %s1018_s7 = inlined_call_operand.vmem [shape: f32[4,512], index: 7, kind: output, shape index: {}]  }
   0x1 LB: > { %s798_s25 = sadd.s32 4294967295, %s848_s24   ;;  %p801_p0 = scmp.ge.s32.totalorder %s848_s24, 1  ;;  %s848_s24 = sphi %s891_s24, %s17_s24  }
   0x2   : > { %p276_p1 = scmp.lt.s32.totalorder %s848_s24, 4 }
   0x4   : > { %p277_p2 = pnand %p801_p0, %p276_p1 }
   0x5   : > { %p322_p3 = scmp.lt.s32.totalorder (!%p277_p2), %s798_s25, 2  ;;  %p808_p4 = scmp.ne.s32.totalorder (!%p277_p2), %s798_s25, 0 }
   0x6   : > { %280 = sbr.rel (%p277_p2) target bundleno = 869 (0x365), region = 48 }
   0xb   : > { %s323_s26 = scalar_select %p322_p3, %s798_s25, 2 }
   0xc   : > { %349 = sbr.rel (%p808_p4) target bundleno = 20 (0x14), region = 52 }
   0xd   : > { %s899_s27 = sshll.u32 %s323_s26, 2 }
   0xe   : > { %s325_s30 = scalar_lea.vmem %s1012_s1, %s899_s27  ;;  %s329_s10 = scalar_lea.vmem %s1013_s2, %s899_s27 }
   0xf   : > { %s333_s13 = scalar_lea.vmem %s1014_s3, %s899_s27  ;;  %s337_s16 = scalar_lea.vmem %s1015_s4, %s899_s27 }
  0x10   : > { %s341_s19 = scalar_lea.vmem %s1016_s5, %s899_s27  ;;  %s345_s22 = scalar_lea.vmem %s1017_s6, %s899_s27 }
  0x11   : > { %v350_v0 = vld [vmem:[%s1011_s0] sm:$0xff]  ;;  %v351_v1 = vld [vmem:[%s1011_s0 + $0x8] sm:$0xff] }
  0x12   : > { %352 = vst [vmem:[%s1018_s7] sm:$0xff] %v350_v0 }
  0x13   : > { %353 = vst [vmem:[%s1018_s7 + $0x8] sm:$0xff] %v351_v1 }
  0x14 PF: > { %vm370_vm0 = vcmask 1043456   ;;  %v356_v4 = vld [vmem:[%s325_s30] sm:$0xf]  ;;  %vm366_vm1 = vcmask 31744   ;;  %v850_v31 = vmov 0  }
  0x15   : > { %836 = vset.pattern.permute.xlu1 %v850_v31  ;;  %837 = vset.pattern.permute.xlu0 %v850_v31  ;;  %v485_v44 = vld [vmem:[%s329_s10] sm:$0xf] }
  0x16   : > { %v498_v49 = vld [vmem:[%s333_s13] sm:$0xf] }
  0x17   : > { %v523_v1 = vld [vmem:[%s337_s16] sm:$0xf] }
  0x19   : > { %v354_v3 = vld [vmem:[%s1018_s7] sm:$0xff] }
  0x1a   : > { %v355_v2 = vld [vmem:[%s1018_s7 + $0x8] sm:$0xff]  ;;  %359 = vst [vmem:[#allocation1] ss:$2 sm:$0xff] %v354_v3 }
  0x1b   : > { %361 = vst [vmem:[#allocation1 + $0x10] ss:$2 sm:$0xff] %v355_v2 }
  0x21   : > { %v362_v7 = vld.sshfl [vmem:[#allocation1] sm:$0xff pattern:$0x75316420]  ;;  %v363_v8 = vld.sshfl [vmem:[#allocation1 + $0x8] sm:$0xff pattern:$0x75316420] }
  0x22   : > { %v364_v5 = vld.sshfl [vmem:[#allocation1 + $0x10] sm:$0xff pattern:$0x75316420]  ;;  %v365_v6 = vld.sshfl [vmem:[#allocation1 + $0x18] sm:$0xff pattern:$0x75316420]  ;;  %809 = vmatpush.msk.msra.mxu0 %vm370_vm0, %v362_v7  ;;  %811 = vmatpush.msk.msra.mxu1 %vm370_vm0, %v363_v8 }
  0x23   : > { %813 = vmatpush.msk.msra.mxu2 %vm370_vm0, %v364_v5  ;;  %815 = vmatpush.msk.msra.mxu3 %vm370_vm0, %v365_v6  ;;  %681 = vst [vmem:[#allocation1 + $0x10] ss:$2 sm:$0xff] %v355_v2 }
  0x24   : > { %814 = vmatmul.msk.f32.vlgmr.msra.gmra.mxu2 %vm366_vm1, %v356_v4  ;;  %816 = vmatmul.msk.f32.vlgmr.msra.gmra.mxu3 %vm366_vm1, %v356_v4  ;;  %679 = vst [vmem:[#allocation1] ss:$2 sm:$0xff] %v354_v3 }
  0x25   : > { %810 = vmatmul.msk.f32.vlgmr.msra.gmra.mxu0 %vm366_vm1, %v356_v4  ;;  %812 = vmatmul.msk.f32.vlgmr.msra.gmra.mxu1 %vm366_vm1, %v356_v4 }
  0xa2   : > { %v396_v9 = vpop.f32.mrf.mxu0  ;;  %v416_v10 = vpop.f32.mrf.mxu1 }
  0xa3   : > { %v459_v11 = vsel %vm370_vm0, %v396_v9, 0.0  ;;  %v468_v12 = vmul.f32 %v396_v9, %v396_v9  ;;  %v460_v13 = vsel %vm370_vm0, %v416_v10, 0.0  ;;  %v469_v14 = vmul.f32 %v416_v10, %v416_v10 }
  0xa4   : > { %v461_v15 = vadd.f32 %v460_v13, %v459_v11 }
  0xa5   : > { %v472_v16 = vsel %vm370_vm0, %v468_v12, 0.0  ;;  %v473_v19 = vsel %vm370_vm0, %v469_v14, 0.0 }
  0xa6   : > { %v474_v25 = vadd.f32 %v473_v19, %v472_v16 }
  0xa7   : > { %v436_v17 = vpop.f32.mrf.mxu2  ;;  %v456_v18 = vpop.f32.mrf.mxu3 }
  0xa8   : > { %v470_v20 = vmul.f32 %v436_v17, %v436_v17  ;;  %v462_v21 = vsel %vm370_vm0, %v436_v17, 0.0  ;;  %v464_v22 = vsel %vm370_vm0, %v456_v18, 0.0  ;;  %v471_v26 = vmul.f32 %v456_v18, %v456_v18 }
  0xa9   : > { %v463_v23 = vadd.f32 %v462_v21, %v461_v15 }
  0xaa   : > { %v475_v27 = vsel %vm370_vm0, %v470_v20, 0.0  ;;  %v477_v29 = vsel %vm370_vm0, %v471_v26, 0.0 }
  0xab   : > { %v465_v24 = vadd.f32 %v464_v22, %v463_v23  ;;  %v476_v28 = vadd.f32 %v475_v27, %v474_v25 }
  0xad   : > { %466 = vadd.xlane.f32.xlu0 %v465_v24  ;;  %v478_v30 = vadd.f32 %v477_v29, %v476_v28 }
  0xb5   : > { %479 = vadd.xlane.f32.xlu0 %v478_v30 }
 0x120   : > { %v467_v32 = vpop.xlane.xlu0 %466 }
 0x121   : > { %v481_v33 = vmul.f32 0.001953125, %v467_v32 }
 0x123   : > { %v483_v35 = vmul.f32 %v481_v33, %v481_v33 }
 0x128   : > { %v480_v34 = vpop.xlane.xlu0 %479 }
 0x129   : > { %v482_v36 = vmul.f32 0.001953125, %v480_v34 }
 0x12b   : > { %v484_v37 = vsub.f32 %v482_v36, %v483_v35  ;;  %v645_v36 = vld [vmem:[%s341_s19] sm:$0xf] }
 0x12d   : > { %v486_v38 = vadd.f32 1e-05, %v484_v37 }
 0x12f   : > { %838 = vrsqrt.f32 %v486_v38  ;;  %vm493_vm3 = vweird.f32 %v486_v38 }
 0x135   : > { %v839_v39 = vpop.eup %838 }
 0x136   : > { %v488_v40 = vmul.f32 %v839_v39, %v486_v38  ;;  %vm494_vm2 = vweird.f32 %v839_v39 }
 0x137   : > { %vm495_vm4 = vmor %vm493_vm3, %vm494_vm2 }
 0x138   : > { %v489_v41 = vmul.f32 %v839_v39, %v488_v40  ;;  %v658_v40 = vld [vmem:[%s345_s22] sm:$0xf] }
 0x13a   : > { %v490_v42 = vmul.f32 0.5, %v489_v41 }
 0x13c   : > { %v491_v43 = vsub.f32 1.5, %v490_v42 }
 0x13e   : > { %v492_v45 = vmul.f32 %v839_v39, %v491_v43 }
 0x140   : > { %v496_v46 = vsel %vm495_vm4, %v839_v39, %v492_v45 }
 0x141   : > { %v497_v47 = vmul.f32 %v496_v46, %v485_v44 }
 0x143   : > { %503 = vperm.xlu1 %836, %v497_v47   ;;  %v499_v48 = vmul.f32 %v497_v47, %v481_v33 }
 0x145   : > { %v500_v50 = vsub.f32 %v498_v49, %v499_v48  ;;  %v682_v48 = vld.sshfl [vmem:[#allocation1] sm:$0xff pattern:$0x75316420]  ;;  %v683_v49 = vld.sshfl [vmem:[#allocation1 + $0x8] sm:$0xff pattern:$0x75316420] }
 0x14b   : > { %512 = vperm.xlu1 %836, %v500_v50   ;;  %v684_v50 = vld.sshfl [vmem:[#allocation1 + $0x10] sm:$0xff pattern:$0x75316420] }
 0x1b5   : > { %v504_v51 = vpop.permute.xlu1 %503 }
 0x1b6   : > { %v506_v52 = vmul.f32 %v504_v51, %v396_v9  ;;  %v507_v53 = vmul.f32 %v504_v51, %v416_v10  ;;  %v508_v54 = vmul.f32 %v504_v51, %v436_v17  ;;  %v509_v55 = vmul.f32 %v504_v51, %v456_v18  ;;  %v685_v51 = vld.sshfl [vmem:[#allocation1 + $0x18] sm:$0xff pattern:$0x75316420] }
 0x1bd   : > { %v513_v56 = vpop.permute.xlu1 %512 }
 0x1be   : > { %v515_v57 = vadd.f32 %v513_v56, %v506_v52  ;;  %v516_v58 = vadd.f32 %v513_v56, %v507_v53  ;;  %v517_v59 = vadd.f32 %v513_v56, %v508_v54  ;;  %v518_v60 = vadd.f32 %v513_v56, %v509_v55 }
 0x1c0   : > { %v519_v61 = vmax.f32 %v515_v57, 0.0  ;;  %v520_v62 = vmax.f32 %v516_v58, 0.0  ;;  %v521_v63 = vmax.f32 %v517_v59, 0.0  ;;  %v522_v0 = vmax.f32 %v518_v60, 0.0 }
 0x1c2   : > { %817 = vmatpush.msk.msrb.mxu0 %vm370_vm0, %v519_v61  ;;  %819 = vmatpush.msk.msrb.mxu1 %vm370_vm0, %v520_v62 }
 0x1c3   : > { %821 = vmatpush.msk.msrb.mxu2 %vm370_vm0, %v521_v63  ;;  %823 = vmatpush.msk.msrb.mxu3 %vm370_vm0, %v522_v0 }
 0x1c4   : > { %822 = vmatmul.msk.f32.vlgmr.msrb.gmra.mxu2 %vm366_vm1, %v523_v1  ;;  %824 = vmatmul.msk.f32.vlgmr.msrb.gmra.mxu3 %vm366_vm1, %v523_v1 }
 0x1c5   : > { %818 = vmatmul.msk.f32.vlgmr.msrb.gmra.mxu0 %vm366_vm1, %v523_v1  ;;  %820 = vmatmul.msk.f32.vlgmr.msrb.gmra.mxu1 %vm366_vm1, %v523_v1 }
 0x242   : > { %v556_v2 = vpop.f32.mrf.mxu0  ;;  %v576_v3 = vpop.f32.mrf.mxu1 }
 0x243   : > { %v619_v4 = vsel %vm370_vm0, %v556_v2, 0.0  ;;  %v628_v5 = vmul.f32 %v556_v2, %v556_v2  ;;  %v620_v6 = vsel %vm370_vm0, %v576_v3, 0.0  ;;  %v629_v7 = vmul.f32 %v576_v3, %v576_v3 }
 0x244   : > { %v621_v8 = vadd.f32 %v620_v6, %v619_v4 }
 0x245   : > { %v632_v9 = vsel %vm370_vm0, %v628_v5, 0.0  ;;  %v633_v12 = vsel %vm370_vm0, %v629_v7, 0.0 }
 0x246   : > { %v634_v17 = vadd.f32 %v633_v12, %v632_v9 }
 0x247   : > { %v596_v10 = vpop.f32.mrf.mxu2  ;;  %v616_v11 = vpop.f32.mrf.mxu3 }
 0x248   : > { %v622_v13 = vsel %vm370_vm0, %v596_v10, 0.0  ;;  %v630_v14 = vmul.f32 %v596_v10, %v596_v10  ;;  %v624_v15 = vsel %vm370_vm0, %v616_v11, 0.0  ;;  %v631_v20 = vmul.f32 %v616_v11, %v616_v11 }
 0x249   : > { %v623_v16 = vadd.f32 %v622_v13, %v621_v8 }
 0x24a   : > { %v635_v19 = vsel %vm370_vm0, %v630_v14, 0.0  ;;  %v637_v22 = vsel %vm370_vm0, %v631_v20, 0.0 }
 0x24b   : > { %v625_v18 = vadd.f32 %v624_v15, %v623_v16  ;;  %v636_v21 = vadd.f32 %v635_v19, %v634_v17 }
 0x24d   : > { %626 = vadd.xlane.f32.xlu2 %v625_v18  ;;  %v638_v23 = vadd.f32 %v637_v22, %v636_v21 }
 0x255   : > { %639 = vadd.xlane.f32.xlu2 %v638_v23 }
 0x2c0   : > { %v627_v24 = vpop.xlane.xlu2 %626 }
 0x2c1   : > { %v641_v25 = vmul.f32 0.001953125, %v627_v24 }
 0x2c3   : > { %v643_v27 = vmul.f32 %v641_v25, %v641_v25 }
 0x2c8   : > { %v640_v26 = vpop.xlane.xlu2 %639 }
 0x2c9   : > { %v642_v28 = vmul.f32 0.001953125, %v640_v26 }
 0x2cb   : > { %v644_v29 = vsub.f32 %v642_v28, %v643_v27 }
 0x2cd   : > { %v646_v30 = vadd.f32 1e-05, %v644_v29 }
 0x2cf   : > { %840 = vrsqrt.f32 %v646_v30  ;;  %vm653_vm6 = vweird.f32 %v646_v30 }
 0x2d5   : > { %v841_v31 = vpop.eup %840 }
 0x2d6   : > { %v648_v32 = vmul.f32 %v841_v31, %v646_v30  ;;  %vm654_vm5 = vweird.f32 %v841_v31 }
 0x2d7   : > { %vm655_vm7 = vmor %vm653_vm6, %vm654_vm5 }
 0x2d8   : > { %v649_v33 = vmul.f32 %v841_v31, %v648_v32 }
 0x2da   : > { %v650_v34 = vmul.f32 0.5, %v649_v33 }
 0x2dc   : > { %v651_v35 = vsub.f32 1.5, %v650_v34 }
 0x2de   : > { %v652_v37 = vmul.f32 %v841_v31, %v651_v35 }
 0x2e0   : > { %v656_v38 = vsel %vm655_vm7, %v841_v31, %v652_v37 }
 0x2e1   : > { %v657_v39 = vmul.f32 %v656_v38, %v645_v36 }
 0x2e3   : > { %663 = vperm.xlu0 %837, %v657_v39   ;;  %v659_v41 = vmul.f32 %v657_v39, %v641_v25 }
 0x2e5   : > { %v660_v42 = vsub.f32 %v658_v40, %v659_v41 }
 0x2e7   : > { %672 = vperm.xlu1 %836, %v660_v42  }
 0x355   : > { %v664_v43 = vpop.permute.xlu0 %663 }
 0x356   : > { %v666_v44 = vmul.f32 %v664_v43, %v556_v2  ;;  %v667_v45 = vmul.f32 %v664_v43, %v576_v3  ;;  %v668_v46 = vmul.f32 %v664_v43, %v596_v10  ;;  %v669_v47 = vmul.f32 %v664_v43, %v616_v11 }
 0x359   : > { %v673_v52 = vpop.permute.xlu1 %672 }
 0x35a   : > { %v675_v53 = vadd.f32 %v673_v52, %v666_v44  ;;  %v676_v54 = vadd.f32 %v673_v52, %v667_v45  ;;  %v677_v55 = vadd.f32 %v673_v52, %v668_v46  ;;  %v678_v56 = vadd.f32 %v673_v52, %v669_v47 }
 0x35c   : > { %v690_v57 = vadd.f32 %v682_v48, %v675_v53  ;;  %v691_v58 = vadd.f32 %v683_v49, %v676_v54  ;;  %v692_v59 = vadd.f32 %v684_v50, %v677_v55  ;;  %v693_v60 = vadd.f32 %v685_v51, %v678_v56 }
 0x35e   : > { %v695_v61 = vmax.f32 %v691_v58, 0.0  ;;  %v697_v62 = vmax.f32 %v693_v60, 0.0  ;;  %v694_v63 = vmax.f32 %v690_v57, 0.0  ;;  %v696_v0 = vmax.f32 %v692_v59, 0.0 }
 0x360   : > { %v702_v1 = vrot.slane %v695_v61, 4  ;;  %v703_v2 = vrot.slane %v697_v62, 4 }
 0x362   : > { %v704_v3 = vsel %vm370_vm0, %v694_v63, %v702_v1  ;;  %v705_v4 = vsel %vm370_vm0, %v696_v0, %v703_v2 }
 0x363   : > { %708 = vst [vmem:[%s1018_s7] sm:$0xff] %v704_v3 }
 0x364   : > { %709 = vst [vmem:[%s1018_s7 + $0x8] sm:$0xff] %v705_v4 }
 0x365 PF: > { %s17_s24 = sadd.s32 1, %s848_s24  }
 0x366   : > { %p14_p5 = scmp.ge.s32.totalorder %s17_s24, 5  }
 0x368   :  { %16 = sbr.rel (!%p14_p5) target bundleno = 1 (0x1), region = 95 }

</bundles_post_ra>
